<compile_context>
chip_gen: v6e
topology: v6e:2x2x1
jax: 0.10.0
libtpu: 0.0.40
codegen_flags: <defaults>
</compile_context>

<pallas_src>
import math

import jax
import jax.numpy as jnp
from jax.experimental import pallas as pl
from jax.experimental.pallas import tpu as pltpu

_LANES = 512                   # last-dim width: multiple of 128 -> unmasked vst
_TARGET_BLOCK_BYTES = 2 << 20  # ~2 MiB per block array (in + out, x2 buffers ~ 8 MiB VMEM)


def _adc_kernel(step_ref, x_ref, o_ref):
    # step_ref: SMEM (1,) f32 scalar; x_ref / o_ref: VMEM (tm, _LANES) tiles.
    # HBM-bound kernel -> the VPU divide/floor cost is fully hidden.
    step = step_ref[0]
    x = x_ref[...].astype(jnp.float32)
    o_ref[...] = jnp.floor(x / step).astype(o_ref.dtype)


@jax.jit
def adc_forward(x: jax.Array, step_size) -> jax.Array:
    """ADC forward: floor(x / step_size). Accepts any input shape (e.g. [B, H, W])."""
    orig_shape = x.shape
    dtype = x.dtype
    n = math.prod(orig_shape) if orig_shape else 1

    itemsize = jnp.dtype(dtype).itemsize
    sublane = 16 if itemsize < 4 else 8

    rows = -(-n // _LANES)
    n_padded = rows * _LANES

    x_flat = jnp.ravel(x)
    if n_padded != n:
        # Only the lane-alignment tail (< 512 elements) is ever padded.
        x_flat = jnp.pad(x_flat, (0, n_padded - n))
    x2d = x_flat.reshape(rows, _LANES)

    # Byte-budgeted, sublane-aligned row tile.
    tm_cap = max(sublane,
                 (_TARGET_BLOCK_BYTES // (_LANES * itemsize)) // sublane * sublane)
    if rows <= tm_cap:
        # Single block equal to the full array dims (satisfies the (8,128)
        # alignment rule even when rows is not a multiple of 8).
        tm = rows
    else:
        # (8,128)-aligned blocks; the final grid step may be a partial block.
        tm = tm_cap
    grid = -(-rows // tm)

    step = jnp.asarray(step_size, dtype=jnp.float32).reshape((1,))

    out2d = pl.pallas_call(
        _adc_kernel,
        out_shape=jax.ShapeDtypeStruct((rows, _LANES), dtype),
        grid_spec=pltpu.PrefetchScalarGridSpec(
            num_scalar_prefetch=0,
            grid=(grid,),
            in_specs=[
                pl.BlockSpec(memory_space=pltpu.SMEM),         # step_size scalar
                pl.BlockSpec((tm, _LANES), lambda r: (r, 0)),  # x row tile
            ],
            out_specs=pl.BlockSpec((tm, _LANES), lambda r: (r, 0)),
        ),
        compiler_params=pltpu.CompilerParams(
            # Row tiles are independent -> megacore sharding on v7x.
            dimension_semantics=("parallel",),
        ),
        cost_estimate=pl.CostEstimate(
            flops=2 * n_padded,
            transcendentals=0,
            bytes_accessed=2 * n_padded * itemsize,
        ),
        # NOTE: if the caller never reuses x, input_output_aliases={1: 0} would
        # halve HBM footprint; left off to keep functional semantics.
    )(step, x2d)

    out_flat = out2d.reshape(-1)
    if n_padded != n:
        out_flat = out_flat[:n]
    return out_flat.reshape(orig_shape)


if __name__ == "__main__":
    # Deterministic parameter init, matching ADC.__init__(init_step=0.5).
    init_step = 0.5
    step_size = jnp.float32(init_step)

    # Small [B, H, W] input, as documented by the module.
    key = jax.random.PRNGKey(0)
    x = jax.random.normal(key, (2, 16, 16), dtype=jnp.float32) * 3.0

    out = jax.block_until_ready(adc_forward(x, step_size))
    ref = jnp.floor(x / step_size)
    assert out.shape == x.shape
    assert out.dtype == x.dtype
    assert bool(jnp.all(out == ref))

    # Non-lane-aligned shape exercises the pad/slice fallback path.
    x2 = jax.random.normal(jax.random.PRNGKey(0), (3, 17, 19), dtype=jnp.float32) * 2.5
    out2 = jax.block_until_ready(adc_forward(x2, step_size))
    ref2 = jnp.floor(x2 / step_size)
    assert out2.shape == x2.shape
    assert bool(jnp.all(out2 == ref2))

    # TODO(synk): STE backward (identity gradient w.r.t. x) is an autograd-time
    # concern; only the forward pass is implemented here.
    print("KERNEL_OK")
</pallas_src>

<mosaic_0001>
module attributes {stable_mosaic.version = 11 : i64} {
  func.func @_adc_kernel(%arg0: i32, %arg1: memref<1xf32, #tpu.memory_space<smem>>, %arg2: memref<1x512xf32, #tpu.memory_space<vmem>>, %arg3: memref<1x512xf32, #tpu.memory_space<vmem>>) attributes {dimension_semantics = [#tpu.dimension_semantics<parallel>], iteration_bounds = array<i64: 1>, scalar_prefetch = 0 : i64, scratch_operands = 0 : i64, tpu.core_type = #tpu.core_type<tc>, window_params = [{transform_indices = @transform_0, window_bounds = array<i64: 1>}, {transform_indices = @transform_1, window_bounds = array<i64: 1, 512>}, {transform_indices = @transform_2, window_bounds = array<i64: 1, 512>}]} {
    %c0 = arith.constant 0 : index
    %0 = memref.load %arg1[%c0] : memref<1xf32, #tpu.memory_space<smem>>
    %c0_0 = arith.constant 0 : index
    %c0_1 = arith.constant 0 : index
    %1 = vector.load %arg2[%c0_0, %c0_1] : memref<1x512xf32, #tpu.memory_space<vmem>>, vector<1x512xf32>
    %2 = vector.broadcast %0 : f32 to vector<1x512xf32>
    %3 = arith.divf %1, %2 : vector<1x512xf32>
    %4 = math.floor %3 : vector<1x512xf32>
    %c0_2 = arith.constant 0 : index
    %c0_3 = arith.constant 0 : index
    %5 = vector.load %arg3[%c0_2, %c0_3] : memref<1x512xf32, #tpu.memory_space<vmem>>, vector<1x512xf32>
    tpu.vector_store %arg3[%c0_2, %c0_3], %4 {strides = array<i32>} : memref<1x512xf32, #tpu.memory_space<vmem>>, vector<1x512xf32>,
    return
  }
  func.func @transform_0(%arg0: i32) -> i32 {
    %c0_i32 = arith.constant 0 : i32
    %c0_i32_0 = arith.constant 0 : i32
    return %c0_i32 : i32
  }
  func.func @transform_1(%arg0: i32) -> (i32, i32) {
    %c0_i32 = arith.constant 0 : i32
    %c0_i32_0 = arith.constant 0 : i32
    return %arg0, %c0_i32 : i32, i32
  }
  func.func @transform_2(%arg0: i32) -> (i32, i32) {
    %c0_i32 = arith.constant 0 : i32
    %c0_i32_0 = arith.constant 0 : i32
    return %arg0, %c0_i32 : i32, i32
  }
}

</mosaic_0001>

<bundles_post_ra>
// kernel: adc_forward.1
= control target key start
LH: loop header
LB: loop body
LE: loop exit
PB: predicated region body
PF: predicated region fallthrough
CT: control target
= control target key end

     0   :  { %v18_v2 = vlaneseq  ;;  %s53_s0 = inlined_call_operand.<no memory space> [shape: f32[1], index: 0, kind: input, shape index: {}]   ;;  %s54_s1 = inlined_call_operand.vmem [shape: f32[1,512], index: 1, kind: input, shape index: {}]   ;;  %s55_s2 = inlined_call_operand.vmem [shape: f32[1,512], index: 2, kind: output, shape index: {}]  }
   0x1   :  { %v14_v0 = vstv %s53_s0  ;;  %v13_v1 = vld [vmem:[%s54_s1] sm:$0xf] }
   0x2   :  { %27 = vrcp.f32 %v14_v0  ;;  %vm20_vm0 = vcmp.lt.s32.totalorder %v18_v2, 512 }
   0xf   :  { %v28_v3 = vpop.eup %27 }
  0x10   :  { %v16_v4 = vmul.f32 %v28_v3, %v13_v1 }
  0x12   :  { %v17_v5 = vfloor.f32 %v16_v4 }
  0x14   :  { %22 = vst.msk [vmem:[%s55_s2] sm:$0xf] %vm20_vm0, %v17_v5 }

</bundles_post_ra>
